<compile_context>
chip_gen: v7x
topology: tpu7x:2x2x1
jax: 0.10.0
libtpu: 0.0.40
codegen_flags: <defaults>
</compile_context>

<pallas_src>
import jax
import jax.numpy as jnp
from jax.experimental import pallas as pl
from jax.experimental.pallas import tpu as pltpu


def biasnet_kernel(xT_ref, w1T_ref, b1_ref, w2T_ref, b2_ref, w3_ref, b3_ref, o_ref):
    xT = xT_ref[...]        # (3, TILE_B)  f32, batch on lanes
    w1T = w1T_ref[...]      # (64, 3)      f32, standardization-folded layer-1 weights

    # Layer 1 (K=3) off the MXU: three broadcast multiply-adds on the VPU (f32).
    h1 = (w1T[:, 0:1] * xT[0:1, :]
          + w1T[:, 1:2] * xT[1:2, :]
          + w1T[:, 2:3] * xT[2:3, :]
          + b1_ref[...])                                     # (64, TILE_B)
    h1 = jnp.maximum(h1, 0.0)

    # Layer 2 on the MXU: bf16 operands, f32 accumulate. w2T is the small (128,64)
    # stationary side; h1 streams along lanes.
    h2 = jnp.dot(w2T_ref[...], h1.astype(jnp.bfloat16),
                 preferred_element_type=jnp.float32) + b2_ref[...]
    h2 = jnp.maximum(h2, 0.0)                                # (128, TILE_B) f32

    # Layer 3 (N=1) off the MXU: elementwise mul + cross-sublane reduce (f32).
    o_ref[...] = jnp.sum(w3_ref[...] * h2, axis=0, keepdims=True) + b3_ref[...]


def _round_up(x, m):
    return ((x + m - 1) // m) * m


def _choose_tiling(B, max_tile_b):
    """Pick (tile_b, B_pad, n_tiles): tile_b a multiple of 128, tail padding < 128 lanes
    per tile, and >=2 grid steps when B >= 256 so v7x can shard both TensorCores."""
    B128 = _round_up(max(B, 1), 128)
    max_tile_b = max(128, _round_up(max_tile_b, 128))
    n_tiles = pl.cdiv(B128, max_tile_b)
    if n_tiles == 1 and B128 >= 256:
        n_tiles = 2
    tile_b = _round_up(pl.cdiv(B128, n_tiles), 128)
    B_pad = n_tiles * tile_b
    return tile_b, B_pad, n_tiles


def biasnet_forward(x, params, tile_b=8192):
    """x: (B, 3). params: mean/std (3,), w1 (3,64), b1 (64,), w2 (64,128), b2 (128,),
    w3 (128,1), b3 (1,). Returns (B, 1) float32."""
    B = x.shape[0]
    x = x.astype(jnp.float32)

    mean = params["mean"].astype(jnp.float32).reshape(3)
    std = params["std"].astype(jnp.float32).reshape(3)
    w1 = params["w1"].astype(jnp.float32)
    b1 = params["b1"].astype(jnp.float32)
    w2 = params["w2"].astype(jnp.float32)
    b2 = params["b2"].astype(jnp.float32)
    w3 = params["w3"].astype(jnp.float32)
    b3 = params["b3"].astype(jnp.float32)

    # Fold standardization into layer 1:
    #   ((x - mean)/std) @ w1 + b1 == x @ (w1/std[:,None]) + (b1 - (mean/std) @ w1)
    # (std == 0 produces inf/nan exactly like the reference module would.)
    w1_eff = w1 / std[:, None]
    b1_eff = b1 - (mean / std) @ w1

    # Pre-transpose to batch-on-lanes layout; w2T in bf16 for the MXU.
    w1T = w1_eff.T                                  # (64, 3)   f32
    b1c = b1_eff.reshape(64, 1)                     # f32
    w2T = w2.T.astype(jnp.bfloat16)                 # (128, 64) bf16 (MXU operand)
    b2c = b2.reshape(128, 1)                        # f32
    w3c = w3.reshape(128, 1)                        # f32
    b3c = b3.reshape(1, 1)                          # f32

    tile_b, B_pad, n_tiles = _choose_tiling(B, tile_b)

    # Lighter relayout: cast -> pad rows -> transpose (no zeros+scatter).
    xT = jnp.pad(x, ((0, B_pad - B), (0, 0))).T     # (3, B_pad) f32

    grid = (n_tiles,)
    moving = lambda shape: pl.BlockSpec(shape, lambda i: (0, i))      # batch-tiled
    resident = lambda shape: pl.BlockSpec(shape, lambda i: (0, 0))    # VMEM-resident params

    flops = B_pad * (2 * 3 * 64 + 2 * 64 * 128 + 2 * 128)
    bytes_accessed = (4 * (4 * B_pad + w1T.size + b1c.size + b2c.size + w3c.size + b3c.size)
                      + 2 * w2T.size)

    outT = pl.pallas_call(
        biasnet_kernel,
        out_shape=jax.ShapeDtypeStruct((1, B_pad), jnp.float32),
        grid=grid,
        in_specs=[
            moving((3, tile_b)),       # xT
            resident((64, 3)),         # w1T (standardization folded)
            resident((64, 1)),         # b1
            resident((128, 64)),       # w2T (bf16)
            resident((128, 1)),        # b2
            resident((128, 1)),        # w3
            resident((1, 1)),          # b3
        ],
        out_specs=moving((1, tile_b)),
        compiler_params=pltpu.CompilerParams(dimension_semantics=("parallel",)),
        cost_estimate=pl.CostEstimate(flops=int(flops), transcendentals=0,
                                      bytes_accessed=int(bytes_accessed)),
    )(xT, w1T, b1c, w2T, b2c, w3c, b3c)

    return outT[0, :B].reshape(B, 1)


def init_params(key):
    """Deterministic synthetic init matching nn.Linear shapes (weights stored (in, out))."""
    ks = jax.random.split(key, 8)

    def linear_init(kw, kb, fan_in, fan_out):
        bound = 1.0 / jnp.sqrt(jnp.float32(fan_in))
        w = jax.random.uniform(kw, (fan_in, fan_out), jnp.float32, -bound, bound)
        b = jax.random.uniform(kb, (fan_out,), jnp.float32, -bound, bound)
        return w, b

    w1, b1 = linear_init(ks[0], ks[1], 3, 64)
    w2, b2 = linear_init(ks[2], ks[3], 64, 128)
    w3, b3 = linear_init(ks[4], ks[5], 128, 1)
    # Module defaults are imean=zeros(3), istd=ones(3); use non-trivial values here
    # to actually exercise the folded standardization path.
    mean = 0.5 * jax.random.normal(ks[6], (3,), jnp.float32)
    std = 1.0 + 0.5 * jnp.abs(jax.random.normal(ks[7], (3,), jnp.float32))
    return dict(mean=mean, std=std, w1=w1, b1=b1, w2=w2, b2=b2, w3=w3, b3=b3)


def biasnet_reference(x, p):
    xs = (x - p["mean"][None, :]) / p["std"][None, :]
    h1 = jnp.maximum(xs @ p["w1"] + p["b1"], 0.0)
    h2 = jnp.maximum(h1 @ p["w2"] + p["b2"], 0.0)
    return h2 @ p["w3"] + p["b3"]


if __name__ == "__main__":
    key = jax.random.PRNGKey(0)
    kx, kp, kx2 = jax.random.split(key, 3)
    params = init_params(kp)

    # Tolerance is loosened vs the pure-f32 version because layer 2 uses bf16 MXU operands.
    ATOL = RTOL = 5e-2

    # Small check (B=8 -> single padded 128-lane tile).
    B = 8
    x = jax.random.normal(kx, (B, 3), dtype=jnp.float32)
    out = jax.block_until_ready(biasnet_forward(x, params))
    ref = biasnet_reference(x, params)
    assert out.shape == (B, 1)
    assert jnp.allclose(out, ref, atol=ATOL, rtol=RTOL), "mismatch vs JAX reference (B=8)"

    # Multi-tile check (B=300 with a small max tile -> multi-step grid + padded tail).
    B2 = 300
    x2 = jax.random.normal(kx2, (B2, 3), dtype=jnp.float32)
    out2 = jax.block_until_ready(biasnet_forward(x2, params, tile_b=128))
    ref2 = biasnet_reference(x2, params)
    assert out2.shape == (B2, 1)
    assert jnp.allclose(out2, ref2, atol=ATOL, rtol=RTOL), "mismatch vs JAX reference (B=300)"

    print("KERNEL_OK")
</pallas_src>

<mosaic_0001>
module attributes {stable_mosaic.version = 11 : i64} {
  func.func @biasnet_kernel(%arg0: i32, %arg1: memref<3x128xf32, #tpu.memory_space<vmem>>, %arg2: memref<64x3xf32, #tpu.memory_space<vmem>>, %arg3: memref<64x1xf32, #tpu.memory_space<vmem>>, %arg4: memref<128x64xbf16, #tpu.memory_space<vmem>>, %arg5: memref<128x1xf32, #tpu.memory_space<vmem>>, %arg6: memref<128x1xf32, #tpu.memory_space<vmem>>, %arg7: memref<1x1xf32, #tpu.memory_space<vmem>>, %arg8: memref<1x128xf32, #tpu.memory_space<vmem>>) attributes {dimension_semantics = [#tpu.dimension_semantics<parallel>], iteration_bounds = array<i64: 1>, scalar_prefetch = 0 : i64, scratch_operands = 0 : i64, tpu.core_type = #tpu.core_type<tc>, window_params = [{transform_indices = @transform_0, window_bounds = array<i64: 3, 128>}, {pipeline_mode = #tpu.pipeline_mode<synchronous>, transform_indices = @transform_1, window_bounds = array<i64: 64, 3>}, {pipeline_mode = #tpu.pipeline_mode<synchronous>, transform_indices = @transform_2, window_bounds = array<i64: 64, 1>}, {pipeline_mode = #tpu.pipeline_mode<synchronous>, transform_indices = @transform_3, window_bounds = array<i64: 128, 64>}, {pipeline_mode = #tpu.pipeline_mode<synchronous>, transform_indices = @transform_4, window_bounds = array<i64: 128, 1>}, {pipeline_mode = #tpu.pipeline_mode<synchronous>, transform_indices = @transform_5, window_bounds = array<i64: 128, 1>}, {pipeline_mode = #tpu.pipeline_mode<synchronous>, transform_indices = @transform_6, window_bounds = array<i64: 1, 1>}, {transform_indices = @transform_7, window_bounds = array<i64: 1, 128>}]} {
    %c0 = arith.constant 0 : index
    %c0_0 = arith.constant 0 : index
    %0 = vector.load %arg1[%c0, %c0_0] : memref<3x128xf32, #tpu.memory_space<vmem>>, vector<3x128xf32>
    %c0_1 = arith.constant 0 : index
    %c0_2 = arith.constant 0 : index
    %1 = vector.load %arg2[%c0_1, %c0_2] : memref<64x3xf32, #tpu.memory_space<vmem>>, vector<64x3xf32>
    %2 = vector.extract_strided_slice %1 {offsets = [0, 0], sizes = [64, 1], strides = [1, 1]} : vector<64x3xf32> to vector<64x1xf32>
    %3 = vector.extract_strided_slice %0 {offsets = [0, 0], sizes = [1, 128], strides = [1, 1]} : vector<3x128xf32> to vector<1x128xf32>
    %4 = vector.broadcast %2 : vector<64x1xf32> to vector<64x128xf32>
    %5 = vector.broadcast %3 : vector<1x128xf32> to vector<64x128xf32>
    %6 = arith.mulf %4, %5 : vector<64x128xf32>
    %7 = vector.extract_strided_slice %1 {offsets = [0, 1], sizes = [64, 1], strides = [1, 1]} : vector<64x3xf32> to vector<64x1xf32>
    %8 = vector.extract_strided_slice %0 {offsets = [1, 0], sizes = [1, 128], strides = [1, 1]} : vector<3x128xf32> to vector<1x128xf32>
    %9 = vector.broadcast %7 : vector<64x1xf32> to vector<64x128xf32>
    %10 = vector.broadcast %8 : vector<1x128xf32> to vector<64x128xf32>
    %11 = arith.mulf %9, %10 : vector<64x128xf32>
    %12 = arith.addf %6, %11 : vector<64x128xf32>
    %13 = vector.extract_strided_slice %1 {offsets = [0, 2], sizes = [64, 1], strides = [1, 1]} : vector<64x3xf32> to vector<64x1xf32>
    %14 = vector.extract_strided_slice %0 {offsets = [2, 0], sizes = [1, 128], strides = [1, 1]} : vector<3x128xf32> to vector<1x128xf32>
    %15 = vector.broadcast %13 : vector<64x1xf32> to vector<64x128xf32>
    %16 = vector.broadcast %14 : vector<1x128xf32> to vector<64x128xf32>
    %17 = arith.mulf %15, %16 : vector<64x128xf32>
    %18 = arith.addf %12, %17 : vector<64x128xf32>
    %c0_3 = arith.constant 0 : index
    %c0_4 = arith.constant 0 : index
    %19 = vector.load %arg3[%c0_3, %c0_4] : memref<64x1xf32, #tpu.memory_space<vmem>>, vector<64x1xf32>
    %20 = vector.broadcast %19 : vector<64x1xf32> to vector<64x128xf32>
    %21 = arith.addf %18, %20 : vector<64x128xf32>
    %cst = arith.constant 0.000000e+00 : f32
    %22 = vector.broadcast %cst : f32 to vector<64x128xf32>
    %23 = arith.maximumf %21, %22 : vector<64x128xf32>
    %c0_5 = arith.constant 0 : index
    %c0_6 = arith.constant 0 : index
    %24 = vector.load %arg4[%c0_5, %c0_6] : memref<128x64xbf16, #tpu.memory_space<vmem>>, vector<128x64xbf16>
    %25 = arith.truncf %23 : vector<64x128xf32> to vector<64x128xbf16>
    %cst_7 = arith.constant dense<0.000000e+00> : vector<128x128xf32>
    %26 = tpu.matmul %24, %25, %cst_7 {dimension_numbers = #tpu.dot_dimension_numbers<[1], [0], [0], [1], [0, 0, 1, 1], [], []>} : vector<128x64xbf16>, vector<64x128xbf16>, vector<128x128xf32> -> vector<128x128xf32>
    %c0_8 = arith.constant 0 : index
    %c0_9 = arith.constant 0 : index
    %27 = vector.load %arg5[%c0_8, %c0_9] : memref<128x1xf32, #tpu.memory_space<vmem>>, vector<128x1xf32>
    %28 = vector.broadcast %27 : vector<128x1xf32> to vector<128x128xf32>
    %29 = arith.addf %26, %28 : vector<128x128xf32>
    %cst_10 = arith.constant 0.000000e+00 : f32
    %30 = vector.broadcast %cst_10 : f32 to vector<128x128xf32>
    %31 = arith.maximumf %29, %30 : vector<128x128xf32>
    %c0_11 = arith.constant 0 : index
    %c0_12 = arith.constant 0 : index
    %32 = vector.load %arg6[%c0_11, %c0_12] : memref<128x1xf32, #tpu.memory_space<vmem>>, vector<128x1xf32>
    %33 = vector.broadcast %32 : vector<128x1xf32> to vector<128x128xf32>
    %34 = arith.mulf %33, %31 : vector<128x128xf32>
    %cst_13 = arith.constant dense<0.000000e+00> : vector<128xf32>
    %35 = vector.multi_reduction <add>, %34, %cst_13 [0] : vector<128x128xf32> to vector<128xf32>
    %36 = vector.shape_cast %35 : vector<128xf32> to vector<1x128xf32>
    %c0_14 = arith.constant 0 : index
    %c0_15 = arith.constant 0 : index
    %37 = vector.load %arg7[%c0_14, %c0_15] : memref<1x1xf32, #tpu.memory_space<vmem>>, vector<1x1xf32>
    %38 = vector.broadcast %37 : vector<1x1xf32> to vector<1x128xf32>
    %39 = arith.addf %36, %38 : vector<1x128xf32>
    %c0_16 = arith.constant 0 : index
    %c0_17 = arith.constant 0 : index
    %40 = vector.load %arg8[%c0_16, %c0_17] : memref<1x128xf32, #tpu.memory_space<vmem>>, vector<1x128xf32>
    tpu.vector_store %arg8[%c0_16, %c0_17], %39 {strides = array<i32>} : memref<1x128xf32, #tpu.memory_space<vmem>>, vector<1x128xf32>,
    return
  }
  func.func @transform_0(%arg0: i32) -> (i32, i32) {
    %c0_i32 = arith.constant 0 : i32
    %c0_i32_0 = arith.constant 0 : i32
    return %c0_i32, %arg0 : i32, i32
  }
  func.func @transform_1(%arg0: i32) -> (i32, i32) {
    %c0_i32 = arith.constant 0 : i32
    %c0_i32_0 = arith.constant 0 : i32
    %c0_i32_1 = arith.constant 0 : i32
    return %c0_i32, %c0_i32_0 : i32, i32
  }
  func.func @transform_2(%arg0: i32) -> (i32, i32) {
    %c0_i32 = arith.constant 0 : i32
    %c0_i32_0 = arith.constant 0 : i32
    %c0_i32_1 = arith.constant 0 : i32
    return %c0_i32, %c0_i32_0 : i32, i32
  }
  func.func @transform_3(%arg0: i32) -> (i32, i32) {
    %c0_i32 = arith.constant 0 : i32
    %c0_i32_0 = arith.constant 0 : i32
    %c0_i32_1 = arith.constant 0 : i32
    return %c0_i32, %c0_i32_0 : i32, i32
  }
  func.func @transform_4(%arg0: i32) -> (i32, i32) {
    %c0_i32 = arith.constant 0 : i32
    %c0_i32_0 = arith.constant 0 : i32
    %c0_i32_1 = arith.constant 0 : i32
    return %c0_i32, %c0_i32_0 : i32, i32
  }
  func.func @transform_5(%arg0: i32) -> (i32, i32) {
    %c0_i32 = arith.constant 0 : i32
    %c0_i32_0 = arith.constant 0 : i32
    %c0_i32_1 = arith.constant 0 : i32
    return %c0_i32, %c0_i32_0 : i32, i32
  }
  func.func @transform_6(%arg0: i32) -> (i32, i32) {
    %c0_i32 = arith.constant 0 : i32
    %c0_i32_0 = arith.constant 0 : i32
    %c0_i32_1 = arith.constant 0 : i32
    return %c0_i32, %c0_i32_0 : i32, i32
  }
  func.func @transform_7(%arg0: i32) -> (i32, i32) {
    %c0_i32 = arith.constant 0 : i32
    %c0_i32_0 = arith.constant 0 : i32
    return %c0_i32, %arg0 : i32, i32
  }
}

</mosaic_0001>

<bundles_post_ra>
// kernel: tpu_custom_call.1
= control target key start
LH: loop header
LB: loop body
LE: loop exit
PB: predicated region body
PF: predicated region fallthrough
CT: control target
= control target key end

     0   :  { %s1122_s0 = inlined_call_operand.vmem [shape: f32[3,128], index: 0, kind: input, shape index: {}]   ;;  %s1123_s1 = inlined_call_operand.vmem [shape: f32[64,3], index: 1, kind: input, shape index: {}]   ;;  %s1124_s2 = inlined_call_operand.vmem [shape: f32[64,1], index: 2, kind: input, shape index: {}]   ;;  %s1125_s3 = inlined_call_operand.vmem [shape: bf16[128,64], index: 3, kind: input, shape index: {}]   ;;  %s1126_s4 = inlined_call_operand.vmem [shape: f32[128,1], index: 4, kind: input, shape index: {}]   ;;  %s1127_s5 = inlined_call_operand.vmem [shape: f32[128,1], index: 5, kind: input, shape index: {}]   ;;  %s1128_s6 = inlined_call_operand.<no memory space> [shape: f32[1,1], index: 6, kind: input, shape index: {}]   ;;  %s1129_s7 = inlined_call_operand.hbm [shape: f32[1,128], index: 7, kind: output, shape index: {}]  }
   0x1   :  { %v12_v0 = vstv %s1128_s6 }
   0x2   :  { %13 = vst [vmem:[#allocation2] sm:$0x1] %v12_v0 }
   0x3   :  { %v31_v1 = vld [vmem:[%s1123_s1] sm:$0xff]  ;;  %v823_v2 = vmov 2   ;;  %v824_v3 = vmov 1   ;;  %v33_v4 = vld [vmem:[%s1123_s1 + $0x10] sm:$0xff]  ;;  %v32_v5 = vld [vmem:[%s1123_s1 + $0x8] sm:$0xff]  ;;  %v825_v8 = vmov 0  }
   0x4   :  { %777 = vset.pattern.permute.xlu0 %v823_v2  ;;  %776 = vset.pattern.permute.xlu1 %v824_v3  ;;  %v36_v6 = vld [vmem:[%s1123_s1 + $0x28] sm:$0xff]  ;;  %v35_v7 = vld [vmem:[%s1123_s1 + $0x20] sm:$0xff]  ;;  %v38_v9 = vld [vmem:[%s1123_s1 + $0x38] sm:$0xff] }
   0x5   :  { %144 = vperm.xlu0 %777, %v31_v1   ;;  %92 = vperm.xlu1 %776, %v31_v1  }
   0x9   :  { %152 = vperm.xlu0 %777, %v33_v4   ;;  %96 = vperm.xlu1 %776, %v32_v5  }
   0xd   :  { %164 = vperm.xlu0 %777, %v36_v6   ;;  %778 = vset.pattern.permute.xlu1 %v823_v2 }
   0xe   :  { %148 = vperm.xlu1 %778, %v32_v5  }
  0x11   :  { %785 = vset.pattern.permute.xlu0 %v824_v3 }
  0x12   :  { %108 = vperm.xlu0 %785, %v35_v7   ;;  %779 = vset.pattern.permute.xlu1 %v825_v8 }
  0x13   :  { %51 = vperm.xlu1 %779, %v33_v4  }
  0x16   :  { %120 = vperm.xlu0 %785, %v38_v9  }
  0x17   :  { %780 = vset.pattern.permute.xlu1 %v824_v3 }
  0x18   :  { %100 = vperm.xlu1 %780, %v33_v4  }
  0x19   :  { %14 = vsyncpa [#allocation4], 0  ;;  %v34_v10 = vld [vmem:[%s1123_s1 + $0x18] sm:$0xff]  ;;  %v195_v11 = vld [vmem:[%s1124_s2] sm:$0xff]  ;;  %vm415_vm0 = vcmask 523264   ;;  %v79_v57 = vlaneseq }
  0x1a   :  { %788 = vset.pattern.permute.xlu0 %v825_v8  ;;  %v196_v12 = vld [vmem:[%s1124_s2 + $0x8] sm:$0xff]  ;;  %v37_v13 = vld [vmem:[%s1123_s1 + $0x30] sm:$0xff]  ;;  %v199_v14 = vld [vmem:[%s1124_s2 + $0x20] sm:$0xff] }
  0x1b   :  { %41 = vperm.xlu0 %788, %v31_v1   ;;  %v202_v15 = vld [vmem:[%s1124_s2 + $0x38] sm:$0xff]  ;;  %v280_v16 = vld [vmem:[%s1126_s4 + $0x8] sm:$0xff]  ;;  %v197_v18 = vld [vmem:[%s1124_s2 + $0x10] sm:$0xff]  ;;  %v1030_v60 = vshrl.u32 %v79_v57, 7 }
  0x1c   :  { %104 = vperm.xlu1 %780, %v34_v10   ;;  %v282_v17 = vld [vmem:[%s1126_s4 + $0x18] sm:$0xff]  ;;  %v553_v19 = vld [vmem:[%s1127_s5] sm:$0xff]  ;;  %v555_v21 = vld [vmem:[%s1127_s5 + $0x10] sm:$0xff] }
  0x1d   :  { %v198_v20 = vld [vmem:[%s1124_s2 + $0x18] sm:$0xff]  ;;  %v557_v23 = vld [vmem:[%s1127_s5 + $0x20] sm:$0xff]  ;;  %v558_v24 = vld [vmem:[%s1127_s5 + $0x28] sm:$0xff]  ;;  %v125_v0 = vsub.s32 1, %v1030_v60  ;;  %v81_v1 = vsub.s32 0, %v1030_v60 }
  0x1e   :  { %v556_v22 = vld [vmem:[%s1127_s5 + $0x18] sm:$0xff]  ;;  %v559_v25 = vld [vmem:[%s1127_s5 + $0x30] sm:$0xff]  ;;  %v200_v27 = vld [vmem:[%s1124_s2 + $0x28] sm:$0xff] }
  0x1f   :  { %46 = vperm.xlu0 %788, %v32_v5   ;;  %v560_v26 = vld [vmem:[%s1127_s5 + $0x38] sm:$0xff]  ;;  %v561_v28 = vld [vmem:[%s1127_s5 + $0x40] sm:$0xff]  ;;  %v201_v29 = vld [vmem:[%s1124_s2 + $0x30] sm:$0xff] }
  0x20   :  { %781 = vset.pattern.permute.xlu1 %v823_v2  ;;  %v562_v30 = vld [vmem:[%s1127_s5 + $0x48] sm:$0xff]  ;;  %v279_v31 = vld [vmem:[%s1126_s4] sm:$0xff]  ;;  %v563_v32 = vld [vmem:[%s1127_s5 + $0x50] sm:$0xff] }
  0x21   :  { %156 = vperm.xlu1 %781, %v34_v10   ;;  %v281_v33 = vld [vmem:[%s1126_s4 + $0x10] sm:$0xff]  ;;  %v791_v34 = vld [vmem:[%s1125_s3] sm:$0xff]   ;;  %v564_v36 = vld [vmem:[%s1127_s5 + $0x58] sm:$0xff] }
  0x22   :  { %v792_v35 = vld [vmem:[%s1125_s3 + $0x20] sm:$0xff]   ;;  %748 = vmatprep.mubr.msk.bf16.mxu0 %vm415_vm0, %v791_v34  ;;  %v554_v39 = vld [vmem:[%s1127_s5 + $0x8] sm:$0xff]  ;;  %v568_v42 = vld [vmem:[%s1127_s5 + $0x78] sm:$0xff] }
  0x23   :  { %56 = vperm.xlu0 %788, %v34_v10   ;;  %v283_v37 = vld [vmem:[%s1126_s4 + $0x20] sm:$0xff]  ;;  %756 = vmatprep.mubr.msk.bf16.mxu1 %vm415_vm0, %v792_v35  ;;  %v566_v40 = vld [vmem:[%s1127_s5 + $0x68] sm:$0xff]  ;;  %v285_v43 = vld [vmem:[%s1126_s4 + $0x30] sm:$0xff] }
  0x24   :  { %v565_v38 = vld [vmem:[%s1127_s5 + $0x60] sm:$0xff]  ;;  %v284_v41 = vld [vmem:[%s1126_s4 + $0x28] sm:$0xff]  ;;  %v286_v44 = vld [vmem:[%s1126_s4 + $0x38] sm:$0xff] }
  0x25   :  { %782 = vset.pattern.permute.xlu1 %v825_v8  ;;  %v287_v45 = vld [vmem:[%s1126_s4 + $0x40] sm:$0xff]  ;;  %v288_v46 = vld [vmem:[%s1126_s4 + $0x48] sm:$0xff]  ;;  %v289_v47 = vld [vmem:[%s1126_s4 + $0x50] sm:$0xff] }
  0x26   :  { %205 = vperm.xlu1 %782, %v195_v11   ;;  %v290_v50 = vld [vmem:[%s1126_s4 + $0x58] sm:$0xff]  ;;  %v291_v53 = vld [vmem:[%s1126_s4 + $0x60] sm:$0xff]  ;;  %v292_v56 = vld [vmem:[%s1126_s4 + $0x68] sm:$0xff] }
  0x27   :  { %210 = vperm.xlu0 %788, %v196_v12   ;;  %v293_v59 = vld [vmem:[%s1126_s4 + $0x70] sm:$0xff]  ;;  %v294_v63 = vld [vmem:[%s1126_s4 + $0x78] sm:$0xff]  ;;  %v686_v11 = vld [vmem:[#allocation2] sm:$0x1] }
  0x28   :  { %v567_v4 = vld [vmem:[%s1127_s5 + $0x70] sm:$0xff] }
  0x2a   :  { %61 = vperm.xlu1 %782, %v35_v7  }
  0x2b   :  { %71 = vperm.xlu0 %788, %v37_v13  }
  0x2e   :  { %66 = vperm.xlu1 %782, %v36_v6  }
  0x2f   :  { %225 = vperm.xlu0 %788, %v199_v14  }
  0x32   :  { %783 = vset.pattern.permute.xlu1 %v824_v3 }
  0x33   :  { %240 = vperm.xlu0 %788, %v202_v15   ;;  %112 = vperm.xlu1 %783, %v36_v6   ;;  %v177_v6 = vsub.s32 2, %v1030_v60 }
  0x37   :  { %302 = vperm.xlu0 %788, %v280_v16   ;;  %784 = vset.pattern.permute.xlu1 %v823_v2 }
  0x38   :  { %160 = vperm.xlu1 %784, %v35_v7  }
  0x3b   :  { %312 = vperm.xlu0 %788, %v282_v17  }
  0x3c   :  { %786 = vset.pattern.permute.xlu1 %v825_v8 }
  0x3d   :  { %215 = vperm.xlu1 %786, %v197_v18  }
  0x3f   :  { %571 = vperm.xlu0 %788, %v553_v19  }
  0x41   :  { %220 = vperm.xlu1 %786, %v198_v20  }
  0x43   :  { %581 = vperm.xlu0 %788, %v555_v21  }
  0x45   :  { %76 = vperm.xlu1 %786, %v38_v9  }
  0x47   :  { %586 = vperm.xlu0 %788, %v556_v22  }
  0x49   :  { %787 = vset.pattern.permute.xlu1 %v824_v3 }
  0x4a   :  { %116 = vperm.xlu1 %787, %v37_v13  }
  0x4b   :  { %591 = vperm.xlu0 %788, %v557_v23  }
  0x4e   :  { %789 = vset.pattern.permute.xlu1 %v823_v2  ;;  %v30_v2 = vld [vmem:[%s1122_s0] sm:$0x7] }
  0x4f   :  { %596 = vperm.xlu0 %788, %v558_v24   ;;  %168 = vperm.xlu1 %789, %v37_v13   ;;  %v1045_v5 = vrot.slane %v30_v2, %v125_v0  ;;  %v1050_v7 = vrot.slane %v30_v2, %v81_v1  ;;  %v1054_v13 = vrot.slane %v30_v2, %v177_v6 }
  0x53   :  { %601 = vperm.xlu0 %788, %v559_v25   ;;  %172 = vperm.xlu1 %789, %v38_v9  }
  0x57   :  { %606 = vperm.xlu0 %788, %v560_v26   ;;  %790 = vset.pattern.permute.xlu1 %v825_v8 }
  0x58   :  { %230 = vperm.xlu1 %790, %v200_v27  }
  0x5b   :  { %611 = vperm.xlu0 %788, %v561_v28  }
  0x5c   :  { %235 = vperm.xlu1 %790, %v201_v29  }
  0x5f   :  { %616 = vperm.xlu0 %788, %v562_v30  }
  0x60   :  { %297 = vperm.xlu1 %790, %v279_v31  }
  0x63   :  { %621 = vperm.xlu0 %788, %v563_v32  }
  0x64   :  { %307 = vperm.xlu1 %790, %v281_v33  }
  0x67   :  { %626 = vperm.xlu0 %788, %v564_v36  }
  0x68   :  { %317 = vperm.xlu1 %790, %v283_v37  }
  0x6b   :  { %631 = vperm.xlu0 %788, %v565_v38  }
  0x6c   :  { %576 = vperm.xlu1 %790, %v554_v39  }
  0x6f   :  { %636 = vperm.xlu0 %788, %v566_v40  }
  0x70   :  { %322 = vperm.xlu1 %790, %v284_v41  }
  0x73   :  { %646 = vperm.xlu0 %788, %v568_v42  }
  0x74   :  { %327 = vperm.xlu1 %790, %v285_v43  }
  0x78   :  { %332 = vperm.xlu1 %790, %v286_v44  }
  0x7c   :  { %337 = vperm.xlu1 %790, %v287_v45  }
  0x80   :  { %342 = vperm.xlu1 %790, %v288_v46  }
  0x84   :  { %347 = vperm.xlu1 %790, %v289_v47   ;;  %v93_v48 = vpop.permute.xlu1 %92  ;;  %v145_v49 = vpop.permute.xlu0 %144 }
  0x85   :  { %v127_v12 = vmul.f32 %v1045_v5, %v93_v48  ;;  %v179_v17 = vmul.f32 %v1054_v13, %v145_v49 }
  0x88   :  { %352 = vperm.xlu1 %790, %v290_v50   ;;  %v97_v51 = vpop.permute.xlu1 %96  ;;  %v153_v52 = vpop.permute.xlu0 %152 }
  0x89   :  { %v128_v15 = vmul.f32 %v1045_v5, %v97_v51  ;;  %v181_v39 = vmul.f32 %v1054_v13, %v153_v52 }
  0x8c   :  { %357 = vperm.xlu1 %790, %v291_v53   ;;  %v1020_v54 = vpop.permute.xlu0 %164 }
  0x8d   :  { %v149_v55 = vpop.permute.xlu1 %148 }
  0x8e   :  { %v180_v22 = vmul.f32 %v1054_v13, %v149_v55 }
  0x90   :  { %362 = vperm.xlu1 %790, %v292_v56  }
  0x91   :  { %v1025_v58 = vpop.permute.xlu0 %108 }
  0x92   :  { %v52_v61 = vpop.permute.xlu1 %51  ;;  %v131_v56 = vmul.f32 %v1045_v5, %v1025_v58 }
  0x93   :  { %v85_v36 = vmul.f32 %v1050_v7, %v52_v61 }
  0x94   :  { %367 = vperm.xlu1 %790, %v293_v59  }
  0x95   :  { %v1032_v62 = vpop.permute.xlu0 %120 }
  0x96   :  { %v134_v6 = vmul.f32 %v1045_v5, %v1032_v62 }
  0x97   :  { %v101_v3 = vpop.permute.xlu1 %100 }
  0x98   :  { %372 = vperm.xlu1 %790, %v294_v63   ;;  %v129_v35 = vmul.f32 %v1045_v5, %v101_v3 }
  0x9a   :  { %v42_v8 = vpop.permute.xlu0 %41  ;;  %v137_v40 = vadd.f32 %v129_v35, %v85_v36  ;;  %v798_v35 = vld [vmem:[%s1125_s3 + $0x38] sm:$0xff]  }
  0x9b   :  { %v105_v9 = vpop.permute.xlu1 %104  ;;  %v83_v10 = vmul.f32 %v1050_v7, %v42_v8 }
  0x9c   :  { %641 = vperm.xlu1 %790, %v567_v4   ;;  %v130_v41 = vmul.f32 %v1045_v5, %v105_v9  ;;  %v189_v45 = vadd.f32 %v181_v39, %v137_v40 }
  0x9d   :  { %v135_v18 = vadd.f32 %v127_v12, %v83_v10  ;;  %v184_v12 = vmul.f32 %v1054_v13, %v1020_v54 }
  0x9e   :  { %v47_v14 = vpop.permute.xlu0 %46 }
  0x9f   :  { %v84_v16 = vmul.f32 %v1050_v7, %v47_v14  ;;  %v187_v23 = vadd.f32 %v179_v17, %v135_v18 }
  0xa0   :  { %689 = vperm.xlu1 %790, %v686_v11   ;;  %v157_v19 = vpop.permute.xlu1 %156 }
  0xa1   :  { %v136_v20 = vadd.f32 %v128_v15, %v84_v16  ;;  %v182_v44 = vmul.f32 %v1054_v13, %v157_v19 }
  0xa2   :  { %v57_v21 = vpop.permute.xlu0 %56 }
  0xa3   :  { %v188_v25 = vadd.f32 %v180_v22, %v136_v20  ;;  %v86_v37 = vmul.f32 %v1050_v7, %v57_v21 }
  0xa5   :  { %v206_v24 = vpop.permute.xlu1 %205  ;;  %v138_v42 = vadd.f32 %v130_v41, %v86_v37 }
  0xa6   :  { %v243_v26 = vadd.f32 %v206_v24, %v187_v23  ;;  %v211_v27 = vpop.permute.xlu0 %210 }
  0xa7   :  { %v244_v28 = vadd.f32 %v211_v27, %v188_v25  ;;  %v190_v47 = vadd.f32 %v182_v44, %v138_v42 }
  0xa8   :  { %v251_v29 = vmax.f32 %v243_v26, 0.0 }
  0xa9   :  { %v252_v30 = vmax.f32 %v244_v28, 0.0  ;;  %v62_v31 = vpop.permute.xlu1 %61 }
  0xaa   :  { %v87_v57 = vmul.f32 %v1050_v7, %v62_v31  ;;  %v72_v59 = vpop.permute.xlu0 %71  ;;  %v794_v31 = vld [vmem:[%s1125_s3 + $0x28] sm:$0xff]  }
  0xab   :  { %v275_v32 = vpack.c.bf16 %v252_v30, %v251_v29  ;;  %v89_v16 = vmul.f32 %v1050_v7, %v72_v59 }
  0xac   :  { %v139_v2 = vadd.f32 %v131_v56, %v87_v57 }
  0xad   :  { %v67_v33 = vpop.permute.xlu1 %66  ;;  %740 = vmatprep.subr.bf16.mxu0 %v275_v32  ;;  %764 = vmatprep.subr.bf16.mxu1 %v275_v32 }
  0xae   :  { %741 = vmatpush3.bf16.msra.mxu0 %v275_v32  ;;  %768 = vmatpush3.bf16.msra.mxu1 %v275_v32  ;;  %v88_v3 = vmul.f32 %v1050_v7, %v67_v33  ;;  %v226_v58 = vpop.permute.xlu0 %225  ;;  %v795_v32 = vld [vmem:[%s1125_s3 + $0x10] sm:$0xff]  }
  0xaf   :  { %v796_v33 = vld [vmem:[%s1125_s3 + $0x30] sm:$0xff]  }
  0xb2   :  { %v113_v34 = vpop.permute.xlu1 %112  ;;  %v241_v23 = vpop.permute.xlu0 %240 }
  0xb3   :  { %v132_v61 = vmul.f32 %v1045_v5, %v113_v34  ;;  %v797_v34 = vld [vmem:[%s1125_s3 + $0x18] sm:$0xff]  }
  0xb5   :  { %v140_v8 = vadd.f32 %v132_v61, %v88_v3 }
  0xb6   :  { %v303_v36 = vpop.permute.xlu0 %302 }
  0xb7   :  { %v161_v38 = vpop.permute.xlu1 %160  ;;  %v192_v20 = vadd.f32 %v184_v12, %v140_v8 }
  0xb8   :  { %v183_v63 = vmul.f32 %v1054_v13, %v161_v38 }
  0xba   :  { %v191_v9 = vadd.f32 %v183_v63, %v139_v2  ;;  %v313_v38 = vpop.permute.xlu0 %312 }
  0xbc   :  { %v216_v43 = vpop.permute.xlu1 %215  ;;  %v247_v17 = vadd.f32 %v226_v58, %v191_v9 }
  0xbd   :  { %v245_v46 = vadd.f32 %v216_v43, %v189_v45 }
  0xbe   :  { %v255_v25 = vmax.f32 %v247_v17, 0.0  ;;  %v572_v40 = vpop.permute.xlu0 %571 }
  0xbf   :  { %v253_v50 = vmax.f32 %v245_v46, 0.0 }
  0xc0   :  { %v221_v48 = vpop.permute.xlu1 %220 }
  0xc1   :  { %v246_v49 = vadd.f32 %v221_v48, %v190_v47 }
  0xc2   :  { %v582_v42 = vpop.permute.xlu0 %581 }
  0xc3   :  { %v254_v51 = vmax.f32 %v246_v49, 0.0 }
  0xc4   :  { %v77_v53 = vpop.permute.xlu1 %76 }
  0xc5   :  { %v276_v55 = vpack.c.bf16 %v254_v51, %v253_v50  ;;  %v90_v4 = vmul.f32 %v1050_v7, %v77_v53 }
  0xc6   :  { %v587_v44 = vpop.permute.xlu0 %586 }
  0xc7   :  { %742 = vmatprep.subr.bf16.mxu0 %v276_v55  ;;  %765 = vmatprep.subr.bf16.mxu1 %v276_v55  ;;  %v142_v14 = vadd.f32 %v134_v6, %v90_v4 }
  0xc8   :  { %743 = vmatpush3.bf16.msra.mxu0 %v276_v55  ;;  %769 = vmatpush3.bf16.msra.mxu1 %v276_v55 }
  0xc9   :  { %v117_v52 = vpop.permute.xlu1 %116 }
  0xca   :  { %v133_v15 = vmul.f32 %v1045_v5, %v117_v52  ;;  %v592_v46 = vpop.permute.xlu0 %591 }
  0xcc   :  { %v141_v21 = vadd.f32 %v133_v15, %v89_v16 }
  0xce   :  { %v169_v0 = vpop.permute.xlu1 %168  ;;  %v597_v48 = vpop.permute.xlu0 %596 }
  0xcf   :  { %v185_v18 = vmul.f32 %v1054_v13, %v169_v0 }
  0xd1   :  { %v193_v27 = vadd.f32 %v185_v18, %v141_v21 }
  0xd2   :  { %v173_v10 = vpop.permute.xlu1 %172  ;;  %v602_v50 = vpop.permute.xlu0 %601 }
  0xd3   :  { %v186_v11 = vmul.f32 %v1054_v13, %v173_v10  ;;  %v793_v13 = vld [vmem:[%s1125_s3 + $0x8] sm:$0xff]   ;;  %s826_s3 = smov [#allocation3]  }
  0xd4   :  { %s704_s11 = sshll.u32 %s826_s3, 4  ;;  %s705_s11 = int_to_ptr.vmem [resolvable:$true] %s704_s11 }
  0xd5   :  { %v194_v19 = vadd.f32 %v186_v11, %v142_v14  ;;  %s799_s2 = scalar_lea.vmem %s705_s11, 16  ;;  %s803_s12 = scalar_lea.vmem %s705_s11, 32 }
  0xd6   :  { %v607_v53 = vpop.permute.xlu0 %606  ;;  %p800_p0 = scmp.ne.s32.totalorder %s705_s11, %s799_s2  ;;  %p804_p1 = scmp.lt.s32.totalorder %s705_s11, %s705_s11 }
  0xd7   :  { %v231_v62 = vpop.permute.xlu1 %230  ;;  %v250_v24 = vadd.f32 %v241_v23, %v194_v19  ;;  %p805_p2 = scmp.lt.s32.totalorder %s803_s12, %s799_s2 }
  0xd8   :  { %v248_v22 = vadd.f32 %v231_v62, %v192_v20 }
  0xd9   :  { %v258_v5 = vmax.f32 %v250_v24, 0.0  ;;  %p806_p3 = por %p805_p2, %p804_p1 }
  0xda   :  { %v256_v26 = vmax.f32 %v248_v22, 0.0  ;;  %v612_v52 = vpop.permute.xlu0 %611 }
  0xdb   :  { %v236_v28 = vpop.permute.xlu1 %235  ;;  %p807_p4 = pnand %p806_p3, %p800_p0 }
  0xdc   :  { %v277_v54 = vpack.c.bf16 %v256_v26, %v255_v25  ;;  %v249_v29 = vadd.f32 %v236_v28, %v193_v27 }
  0xde   :  { %v257_v30 = vmax.f32 %v249_v29, 0.0  ;;  %744 = vmatprep.subr.bf16.mxu0 %v277_v54  ;;  %766 = vmatprep.subr.bf16.mxu1 %v277_v54  ;;  %v1105_v57 = vpop.permute.xlu0 %616 }
  0xdf   :  { %745 = vmatpush3.bf16.msra.mxu0 %v277_v54  ;;  %770 = vmatpush3.bf16.msra.mxu1 %v277_v54  ;;  %v298_v37 = vpop.permute.xlu1 %297 }
  0xe0   :  { %v278_v7 = vpack.c.bf16 %v258_v5, %v257_v30 }
  0xe2   :  { %746 = vmatprep.subr.bf16.mxu0 %v278_v7  ;;  %767 = vmatprep.subr.bf16.mxu1 %v278_v7  ;;  %v622_v16 = vpop.permute.xlu0 %621 }
  0xe3   :  { %747 = vmatpush3.bf16.msra.mxu0 %v278_v7  ;;  %771 = vmatpush3.bf16.msra.mxu1 %v278_v7  ;;  %v308_v39 = vpop.permute.xlu1 %307 }
  0xe6   :  { %749 = vmatmul.mubr.msk.bf16.vlgmr.msra.gmra.mrb[0].mxu0 %vm415_vm0, %v793_v13  ;;  %757 = vmatmul.mubr.msk.bf16.vlgmr.msra.gmra.mrb[0].mxu1 %vm415_vm0, %v794_v31 }
  0xe7   :  { %752 = vmatprep.mubr.msk.bf16.mxu0 %vm415_vm0, %v795_v32  ;;  %760 = vmatprep.mubr.msk.bf16.mxu1 %vm415_vm0, %v796_v33  ;;  %v318_v41 = vpop.permute.xlu1 %317 }
  0xeb   :  { %v577_v43 = vpop.permute.xlu1 %576 }
  0xee   :  { %753 = vmatmul.mubr.msk.bf16.gmra.mrb[4].mxu0 %vm415_vm0, %v797_v34  ;;  %761 = vmatmul.mubr.msk.bf16.gmra.mrb[4].mxu1 %vm415_vm0, %v798_v35 }
  0xef   :  { %v323_v45 = vpop.permute.xlu1 %322 }
  0xf3   :  { %v328_v47 = vpop.permute.xlu1 %327 }
  0xf7   :  { %v333_v49 = vpop.permute.xlu1 %332 }
  0xfb   :  { %v338_v51 = vpop.permute.xlu1 %337 }
  0xff   :  { %v343_v55 = vpop.permute.xlu1 %342 }
 0x103   :  { %v348_v56 = vpop.permute.xlu1 %347 }
 0x107   :  { %v353_v59 = vpop.permute.xlu1 %352 }
 0x10b   :  { %v358_v17 = vpop.permute.xlu1 %357 }
 0x1b9   :  { %v750_v61 = vpop.f32.mrb[0].mxu0  ;;  %v758_v63 = vpop.f32.mrb[0].mxu1 }
 0x1ba   :  { %v474_v0 = vpop.f32.mrb[1].mxu0  ;;  %v506_v2 = vpop.f32.mrb[1].mxu1  ;;  %v483_v3 = vadd.f32 %v750_v61, %v308_v39 }
 0x1bb   :  { %v475_v4 = vadd.f32 %v474_v0, %v298_v37  ;;  %v751_v6 = vpop.f32.mrb[2].mxu0  ;;  %v759_v8 = vpop.f32.mrb[2].mxu1  ;;  %v507_v33 = vadd.f32 %v506_v2, %v338_v51 }
 0x1bc   :  { %v486_v9 = vadd.f32 %v751_v6, %v313_v38  ;;  %v477_v10 = vpop.f32.mrb[3].mxu0  ;;  %v509_v58 = vpop.f32.mrb[3].mxu1  ;;  %v539_v14 = vmax.f32 %v483_v3, 0.0  ;;  %v518_v3 = vadd.f32 %v759_v8, %v353_v59 }
 0x1bd   :  { %v537_v11 = vmax.f32 %v475_v4, 0.0  ;;  %v478_v12 = vadd.f32 %v477_v10, %v303_v36  ;;  %v363_v38 = vpop.permute.xlu1 %362  ;;  %v510_v39 = vadd.f32 %v509_v58, %v343_v55  ;;  %v545_v61 = vmax.f32 %v507_v33, 0.0 }
 0x1be   :  { %v540_v18 = vmax.f32 %v486_v9, 0.0  ;;  %v651_v24 = vmul.f32 %v582_v42, %v539_v14 }
 0x1bf   :  { %v538_v15 = vmax.f32 %v478_v12, 0.0  ;;  %v649_v19 = vmul.f32 %v572_v40, %v537_v11  ;;  %v546_v4 = vmax.f32 %v510_v39, 0.0  ;;  %v657_v2 = vmul.f32 %v612_v52, %v545_v61 }
 0x1c0   :  { %v652_v29 = vmul.f32 %v587_v44, %v540_v18  ;;  %v548_v11 = vmax.f32 %v518_v3, 0.0 }
 0x1c1   :  { %v650_v20 = vmul.f32 %v577_v43, %v538_v15  ;;  %v754_v62 = vpop.f32.mrb[4].mxu0  ;;  %v762_v21 = vpop.f32.mrb[4].mxu1  ;;  %v658_v55 = vmul.f32 %v1105_v57, %v546_v4 }
 0x1c2   :  { %v490_v22 = vpop.f32.mrb[5].mxu0  ;;  %v522_v23 = vpop.f32.mrb[5].mxu1  ;;  %v499_v26 = vadd.f32 %v754_v62, %v328_v47  ;;  %v515_v47 = vadd.f32 %v758_v63, %v348_v56 }
 0x1c3   :  { %v665_v25 = vadd.f32 %v650_v20, %v649_v19  ;;  %v491_v27 = vadd.f32 %v490_v22, %v318_v41  ;;  %v755_v28 = vpop.f32.mrb[6].mxu0  ;;  %v763_v54 = vpop.f32.mrb[6].mxu1 }
 0x1c4   :  { %v493_v30 = vpop.f32.mrb[7].mxu0  ;;  %v525_v5 = vpop.f32.mrb[7].mxu1  ;;  %v502_v31 = vadd.f32 %v755_v28, %v333_v49  ;;  %v543_v34 = vmax.f32 %v499_v26, 0.0  ;;  %v547_v51 = vmax.f32 %v515_v47, 0.0 }
 0x1c5   :  { %v666_v7 = vadd.f32 %v665_v25, %v651_v24  ;;  %v541_v13 = vmax.f32 %v491_v27, 0.0  ;;  %v494_v32 = vadd.f32 %v493_v30, %v323_v45  ;;  %v627_v41 = vpop.permute.xlu0 %626  ;;  %v368_v45 = vpop.permute.xlu1 %367 }
 0x1c6   :  { %v544_v42 = vmax.f32 %v502_v31, 0.0  ;;  %v655_v44 = vmul.f32 %v602_v50, %v543_v34  ;;  %v659_v12 = vmul.f32 %v622_v16, %v547_v51  ;;  %v531_v56 = vadd.f32 %v762_v21, %v368_v45 }
 0x1c7   :  { %v653_v35 = vmul.f32 %v592_v46, %v541_v13  ;;  %v667_v36 = vadd.f32 %v666_v7, %v652_v29  ;;  %v542_v37 = vmax.f32 %v494_v32, 0.0  ;;  %v523_v46 = vadd.f32 %v522_v23, %v358_v17 }
 0x1c8   :  { %v656_v6 = vmul.f32 %v607_v53, %v544_v42  ;;  %v660_v59 = vmul.f32 %v627_v41, %v548_v11  ;;  %v551_v19 = vmax.f32 %v531_v56, 0.0 }
 0x1c9   :  { %v668_v40 = vadd.f32 %v667_v36, %v653_v35  ;;  %v654_v43 = vmul.f32 %v597_v48, %v542_v37  ;;  %v632_v10 = vpop.permute.xlu0 %631  ;;  %v526_v48 = vadd.f32 %v525_v5, %v363_v38  ;;  %v549_v63 = vmax.f32 %v523_v46, 0.0  ;;  %v373_v14 = vpop.permute.xlu1 %372 }
 0x1ca   :  { %v534_v8 = vadd.f32 %v763_v54, %v373_v14 }
 0x1cb   :  { %v669_v0 = vadd.f32 %v668_v40, %v654_v43  ;;  %v550_v53 = vmax.f32 %v526_v48, 0.0  ;;  %v661_v52 = vmul.f32 %v632_v10, %v549_v63 }
 0x1cc   :  { %v552_v20 = vmax.f32 %v534_v8, 0.0 }
 0x1cd   :  { %v670_v49 = vadd.f32 %v669_v0, %v655_v44  ;;  %v637_v18 = vpop.permute.xlu0 %636  ;;  %v642_v23 = vpop.permute.xlu1 %641 }
 0x1ce   :  { %v662_v62 = vmul.f32 %v637_v18, %v550_v53  ;;  %v663_v57 = vmul.f32 %v642_v23, %v551_v19 }
 0x1cf   :  { %v671_v9 = vadd.f32 %v670_v49, %v656_v6 }
 0x1d1   :  { %v672_v58 = vadd.f32 %v671_v9, %v657_v2  ;;  %v647_v25 = vpop.permute.xlu0 %646  ;;  %v690_v30 = vpop.permute.xlu1 %689 }
 0x1d2   :  { %v664_v16 = vmul.f32 %v647_v25, %v552_v20  ;;  %v695_v7 = vrot.slane %v690_v30, %v81_v1 }
 0x1d3   :  { %v673_v50 = vadd.f32 %v672_v58, %v658_v55 }
 0x1d5   :  { %v674_v15 = vadd.f32 %v673_v50, %v659_v12 }
 0x1d7   :  { %v675_v17 = vadd.f32 %v674_v15, %v660_v59 }
 0x1d9   :  { %v676_v22 = vadd.f32 %v675_v17, %v661_v52 }
 0x1db   :  { %v677_v24 = vadd.f32 %v676_v22, %v662_v62 }
 0x1dd   :  { %v678_v21 = vadd.f32 %v677_v24, %v663_v57 }
 0x1df   :  { %v679_v26 = vadd.f32 %v678_v21, %v664_v16 }
 0x1e1   :  { %v680_v27 = vrot.slane %v679_v26, 4 }
 0x1e3   :  { %v681_v28 = vadd.f32 %v680_v27, %v679_v26 }
 0x1e5   :  { %v682_v29 = vrot.slane %v681_v28, 2 }
 0x1e7   :  { %v683_v54 = vadd.f32 %v682_v29, %v681_v28 }
 0x1e9   :  { %v684_v5 = vrot.slane %v683_v54, 1 }
 0x1eb   :  { %v685_v13 = vadd.f32 %v684_v5, %v683_v54 }
 0x1ed   :  { %v696_v31 = vadd.f32 %v695_v7, %v685_v13 }
 0x1ef   :  { %697 = vst [vmem:[#allocation3] sm:$0x1] %v696_v31 }
 0x1f0   :  { %810 = shalt.err (!%p807_p4)
}
 0x1f1   :  { %s811_s15 = scalar_lea.hbm %s1129_s7, 16 }
 0x1f2   :  { %p812_p5 = scmp.ne.s32.totalorder %s1129_s7, %s811_s15  ;;  %p815_p6 = scmp.lt.u32.totalorder %s811_s15, %s1129_s7 }
 0x1f4   :  { %p817_p7 = pnand %p815_p6, %p812_p5 }
 0x1f6   :  { %820 = shalt.err (!%p817_p7)
}
 0x1f7   :  { %707 = dma.vmem_to_hbm [thread:$0]  %s705_s11, 16, %s1129_s7, [#allocation4]  }
 0x1f8   :  { %821 = dma.done.wait [#allocation4], 16  }
 0x1f9   :  { %822 = vsyncadd [#allocation4], 4294967280 }
 0x1fa   :  { %711 = vsyncpa [#allocation4], 1 }

</bundles_post_ra>
